<compile_context>
chip_gen: v6e
topology: v6e:2x2x1
jax: 0.10.0
libtpu: 0.0.40
codegen_flags: <defaults>
</compile_context>

<pallas_src>
import math

import jax
import jax.numpy as jnp
from jax.experimental import pallas as pl
from jax.experimental.pallas import tpu as pltpu

EPSILON = 1e-15


def gaussian_ll_kernel(x_ref, a_ref, b_ref, g_ref, c_ref, o_ref):
    # x_ref: (TILE_R, 128)  -- PACK samples packed per 128-lane row
    # a_ref: (128, 128)     -- kron(I_PACK, -0.5 * inv_sigma), resident
    # b_ref: (1, 128)       -- inv_sigma @ mu tiled PACK times, resident
    # g_ref: (128, PACK)    -- 0/1 group-sum selector, resident
    # c_ref: (1, 1) SMEM    -- 0.5*mu'invS mu + log_sqrt_den
    # o_ref: (TILE_R, PACK) -- per-sample log-likelihoods, packed
    x = x_ref[...]
    t = jnp.dot(x, a_ref[...], preferred_element_type=jnp.float32) + b_ref[...]
    prod = x * t                                                   # (TILE_R, 128), full-width VPU
    o_ref[...] = (jnp.dot(prod, g_ref[...], preferred_element_type=jnp.float32)
                  - c_ref[0, 0])


def gaussian_forward(X, mu, inv_sigma, log_sqrt_den, *, tile_rows=1024):
    """X: (N, D) f32; mu: (D,) f32; inv_sigma: (D, D) f32; log_sqrt_den: scalar f32."""
    N, D = X.shape
    # TODO(synk): general D that does not divide 128 would need zero-padding of the
    # feature axis; the module is used with small dims (here 16), so we assert.
    assert D <= 128 and 128 % D == 0, "feature dim must divide 128"
    PACK = 128 // D                      # samples packed per 128-lane row
    LANES = PACK * D                     # == 128

    f32 = jnp.float32
    Xf = X.astype(f32)
    invS = inv_sigma.astype(f32)
    mu_f = mu.astype(f32)

    # --- fold mu into the quadratic form (done once, outside the hot loop) ---
    A = -0.5 * invS                                        # (D, D)
    b = 0.5 * (invS + invS.T) @ mu_f                       # (D,)  (exact even if pinv not symmetric)
    c = mu_f @ invS @ mu_f                                 # scalar
    const = (0.5 * c + jnp.asarray(log_sqrt_den, f32)).reshape(1, 1)

    # --- lane packing operands ---
    A_block = jnp.kron(jnp.eye(PACK, dtype=f32), A)        # (128, 128) block diagonal
    b_tiled = jnp.tile(b, PACK).reshape(1, LANES)          # (1, 128)
    G = (jnp.arange(LANES)[:, None] // D
         == jnp.arange(PACK)[None, :]).astype(f32)         # (128, PACK) group-sum selector

    # --- tiling over packed rows ---
    R = -(-N // PACK)                                      # packed rows needed
    tile_rows = max(8, (tile_rows // 8) * 8)
    TILE_R = min(tile_rows, -(-R // 8) * 8)                # multiple of 8 sublanes
    R_pad = -(-R // TILE_R) * TILE_R
    N_pad = R_pad * PACK

    Xp = jnp.pad(Xf, ((0, N_pad - N), (0, 0))).reshape(R_pad, LANES)   # free row-major reshape

    grid = (R_pad // TILE_R,)
    out_packed = pl.pallas_call(
        gaussian_ll_kernel,
        out_shape=jax.ShapeDtypeStruct((R_pad, PACK), f32),
        grid=grid,
        in_specs=[
            pl.BlockSpec((TILE_R, LANES), lambda i: (i, 0)),   # X tiles: pipelined, double-buffered
            pl.BlockSpec((LANES, LANES), lambda i: (0, 0)),    # A_block: resident
            pl.BlockSpec((1, LANES), lambda i: (0, 0)),        # b_tiled: resident
            pl.BlockSpec((LANES, PACK), lambda i: (0, 0)),     # G: resident
            pl.BlockSpec(memory_space=pltpu.SMEM),             # const scalar
        ],
        out_specs=pl.BlockSpec((TILE_R, PACK), lambda i: (i, 0)),
        compiler_params=pltpu.CompilerParams(
            dimension_semantics=("parallel",)),                # shard row tiles across TCs on v7x
    )(Xp, A_block, b_tiled, G, const)

    # unpack: out_packed[r, j] is the log-likelihood of sample r*PACK + j
    return out_packed.reshape(N_pad, 1)[:N]


def reference_forward(X, mu, inv_sigma, log_sqrt_den):
    diff = X - mu[None, :]
    quad = jnp.einsum("nd,de,ne->n", diff, inv_sigma, diff)
    return (-0.5 * quad - log_sqrt_den)[:, None]


if __name__ == "__main__":
    key = jax.random.PRNGKey(0)
    k_mu, k_eps, k_x = jax.random.split(key, 3)

    dims = 16   # feature dimension (D)
    N = 200     # number of samples (not a multiple of 8 -> exercises padding)

    # Deterministic parameter init mirroring the module's __init__:
    #   mu    = (rand(dims) - 0.5) * 2.0
    #   sigma = eye(dims)
    mu = (jax.random.uniform(k_mu, (dims,), dtype=jnp.float32) - 0.5) * 2.0
    sigma = jnp.eye(dims, dtype=jnp.float32)

    # forward-time jitter:  sigma + (rand(dims,dims) - 0.5) * EPSILON
    epsilon = (jax.random.uniform(k_eps, (dims, dims), dtype=jnp.float32) - 0.5) * EPSILON
    sigma_eff = sigma + epsilon

    # Parameter setup in plain JAX (no Pallas equivalent for pinv / logdet).
    inv_sigma = jnp.linalg.pinv(sigma_eff)
    sign, log_det_sigma = jnp.linalg.slogdet(sigma_eff)
    log_two_pi_dims = dims * (math.log(2.0) + math.log(math.pi))
    log_sqrt_den = 0.5 * (log_two_pi_dims + log_det_sigma)

    # Input samples.
    X = jax.random.normal(k_x, (N, dims), dtype=jnp.float32)

    # Small tile_rows here to exercise a multi-step grid on this small demo;
    # production default (1024 rows == 8192 samples/tile) amortizes step overhead.
    out = gaussian_forward(X, mu, inv_sigma, log_sqrt_den, tile_rows=8)
    out = jax.block_until_ready(out)

    ref = reference_forward(X, mu, inv_sigma, log_sqrt_den)
    assert out.shape == (N, 1)
    assert jnp.allclose(out, ref, atol=2e-4, rtol=1e-4), (out, ref)

    print("KERNEL_OK")
</pallas_src>

<mosaic_0001>
module attributes {stable_mosaic.version = 11 : i64} {
  func.func @gaussian_ll_kernel(%arg0: i32, %arg1: memref<8x128xf32, #tpu.memory_space<vmem>>, %arg2: memref<128x128xf32, #tpu.memory_space<vmem>>, %arg3: memref<1x128xf32, #tpu.memory_space<vmem>>, %arg4: memref<128x8xf32, #tpu.memory_space<vmem>>, %arg5: memref<1x1xf32, #tpu.memory_space<smem>>, %arg6: memref<8x8xf32, #tpu.memory_space<vmem>>) attributes {dimension_semantics = [#tpu.dimension_semantics<parallel>], iteration_bounds = array<i64: 4>, scalar_prefetch = 0 : i64, scratch_operands = 0 : i64, tpu.core_type = #tpu.core_type<tc>, window_params = [{transform_indices = @transform_0, window_bounds = array<i64: 8, 128>}, {pipeline_mode = #tpu.pipeline_mode<synchronous>, transform_indices = @transform_1, window_bounds = array<i64: 128, 128>}, {pipeline_mode = #tpu.pipeline_mode<synchronous>, transform_indices = @transform_2, window_bounds = array<i64: 1, 128>}, {pipeline_mode = #tpu.pipeline_mode<synchronous>, transform_indices = @transform_3, window_bounds = array<i64: 128, 8>}, {transform_indices = @transform_4, window_bounds = array<i64: 1, 1>}, {transform_indices = @transform_5, window_bounds = array<i64: 8, 8>}]} {
    %c0 = arith.constant 0 : index
    %c0_0 = arith.constant 0 : index
    %0 = vector.load %arg1[%c0, %c0_0] : memref<8x128xf32, #tpu.memory_space<vmem>>, vector<8x128xf32>
    %c0_1 = arith.constant 0 : index
    %c0_2 = arith.constant 0 : index
    %1 = vector.load %arg2[%c0_1, %c0_2] : memref<128x128xf32, #tpu.memory_space<vmem>>, vector<128x128xf32>
    %cst = arith.constant dense<0.000000e+00> : vector<8x128xf32>
    %2 = tpu.matmul %0, %1, %cst {dimension_numbers = #tpu.dot_dimension_numbers<[1], [0], [0], [1], [0, 0, 1, 1], [], []>} : vector<8x128xf32>, vector<128x128xf32>, vector<8x128xf32> -> vector<8x128xf32>
    %c0_3 = arith.constant 0 : index
    %c0_4 = arith.constant 0 : index
    %3 = vector.load %arg3[%c0_3, %c0_4] : memref<1x128xf32, #tpu.memory_space<vmem>>, vector<1x128xf32>
    %4 = vector.broadcast %3 : vector<1x128xf32> to vector<8x128xf32>
    %5 = arith.addf %2, %4 : vector<8x128xf32>
    %6 = arith.mulf %0, %5 : vector<8x128xf32>
    %c0_5 = arith.constant 0 : index
    %c0_6 = arith.constant 0 : index
    %7 = vector.load %arg4[%c0_5, %c0_6] : memref<128x8xf32, #tpu.memory_space<vmem>>, vector<128x8xf32>
    %cst_7 = arith.constant dense<0.000000e+00> : vector<8x8xf32>
    %8 = tpu.matmul %6, %7, %cst_7 {dimension_numbers = #tpu.dot_dimension_numbers<[1], [0], [0], [1], [0, 0, 1, 1], [], []>} : vector<8x128xf32>, vector<128x8xf32>, vector<8x8xf32> -> vector<8x8xf32>
    %c0_8 = arith.constant 0 : index
    %c0_9 = arith.constant 0 : index
    %9 = memref.load %arg5[%c0_8, %c0_9] : memref<1x1xf32, #tpu.memory_space<smem>>
    %10 = vector.broadcast %9 : f32 to vector<8x8xf32>
    %11 = arith.subf %8, %10 : vector<8x8xf32>
    %c0_10 = arith.constant 0 : index
    %c0_11 = arith.constant 0 : index
    %12 = vector.load %arg6[%c0_10, %c0_11] : memref<8x8xf32, #tpu.memory_space<vmem>>, vector<8x8xf32>
    tpu.vector_store %arg6[%c0_10, %c0_11], %11 {strides = array<i32>} : memref<8x8xf32, #tpu.memory_space<vmem>>, vector<8x8xf32>,
    return
  }
  func.func @transform_0(%arg0: i32) -> (i32, i32) {
    %c0_i32 = arith.constant 0 : i32
    %c0_i32_0 = arith.constant 0 : i32
    return %arg0, %c0_i32 : i32, i32
  }
  func.func @transform_1(%arg0: i32) -> (i32, i32) {
    %c0_i32 = arith.constant 0 : i32
    %c0_i32_0 = arith.constant 0 : i32
    %c0_i32_1 = arith.constant 0 : i32
    return %c0_i32, %c0_i32_0 : i32, i32
  }
  func.func @transform_2(%arg0: i32) -> (i32, i32) {
    %c0_i32 = arith.constant 0 : i32
    %c0_i32_0 = arith.constant 0 : i32
    %c0_i32_1 = arith.constant 0 : i32
    return %c0_i32, %c0_i32_0 : i32, i32
  }
  func.func @transform_3(%arg0: i32) -> (i32, i32) {
    %c0_i32 = arith.constant 0 : i32
    %c0_i32_0 = arith.constant 0 : i32
    %c0_i32_1 = arith.constant 0 : i32
    return %c0_i32, %c0_i32_0 : i32, i32
  }
  func.func @transform_4(%arg0: i32) -> (i32, i32) {
    %c0_i32 = arith.constant 0 : i32
    %c0_i32_0 = arith.constant 0 : i32
    %c0_i32_1 = arith.constant 0 : i32
    return %c0_i32, %c0_i32_0 : i32, i32
  }
  func.func @transform_5(%arg0: i32) -> (i32, i32) {
    %c0_i32 = arith.constant 0 : i32
    %c0_i32_0 = arith.constant 0 : i32
    return %arg0, %c0_i32 : i32, i32
  }
}

</mosaic_0001>

<bundles_post_ra>
// kernel: tpu_custom_call.1
= control target key start
LH: loop header
LB: loop body
LE: loop exit
PB: predicated region body
PF: predicated region fallthrough
CT: control target
= control target key end

     0   :  { %s986_s0 = inlined_call_operand.hbm [shape: f32[32,128], index: 0, kind: input, shape index: {}]   ;;  %s987_s1 = inlined_call_operand.vmem [shape: f32[128,128], index: 1, kind: input, shape index: {}]   ;;  %s988_s2 = inlined_call_operand.vmem [shape: f32[1,128], index: 2, kind: input, shape index: {}]   ;;  %s989_s3 = inlined_call_operand.vmem [shape: f32[128,8], index: 3, kind: input, shape index: {}]   ;;  %s990_s4 = inlined_call_operand.<no memory space> [shape: f32[1,1], index: 4, kind: input, shape index: {}]   ;;  %s991_s5 = inlined_call_operand.vmem [shape: f32[32,8], index: 5, kind: output, shape index: {}]  }
   0x1   :  { %10 = sst [smem:[#allocation2]] %s990_s4 }
   0x2   :  { %11 = vsyncpa [#allocation4], 0 }
   0x3   :  { %13 = vsyncpa [#allocation4 + $0x1], 0  ;;  %s748_s20 = smov 0   ;;  %s750_s21 = smov 0  }
   0x4   :  { %s752_s22 = smov 0   ;;  %s754_s23 = smov 0  }
   0x5 LB: > { %s767_s4 = sadd.s32 4294967295, %s710_s23   ;;  %s770_s24 = sadd.s32 1, %s710_s23   ;;  %s710_s23 = sphi %s754_s23, %s1001_s23   ;;  %s706_s22 = sphi %s752_s22, %s1000_s22   ;;  %s702_s21 = sphi %s750_s21, %s999_s21   ;;  %s698_s20 = sphi %s748_s20, %s998_s20  }
   0x6   : > { %s23_s25 = ssub.s32 %s710_s23, %s770_s24  ;;  %s26_s26 = sadd.s32 1, %s706_s22 }
   0x7   : > { %p24_p0 = scmp.eq.s32.totalorder %s23_s25, 0  ;;  %p33_p1 = scmp.ne.s32.totalorder %s706_s22, %s702_s21 }
   0x8   : > { %p34_p2 = scmp.eq.s32.totalorder %s710_s23, 0  ;;  %p39_p3 = scmp.ne.s32.totalorder %s702_s21, %s698_s20 }
   0x9   : > { %s780_s27 = scalar_select %p24_p0, %s706_s22, %s26_s26  }
   0xa   : > { %p35_p4 = por %p34_p2, %p33_p1  ;;  %p40_p5 = scmp.eq.s32.totalorder %s767_s4, 0 }
   0xb   : > { %p613_p6 = scmp.lt.s32.totalorder %s710_s23, 4  ;;  %s185_s29 = sand.u32 1, %s706_s22  }
   0xc   : > { %p784_p7 = por %p40_p5, %p39_p3  ;;  %s495_s30 = sshll.u32 %s185_s29, 3 }
   0xd   : > { %s496_s6 = sshll.u32 %s710_s23, 7  ;;  %s189_s10 = scalar_lea.vmem [#allocation3], %s495_s30 }
   0xe   : > { %s993_s28 = scalar_select %p784_p7, 1, 0 }
   0xf   : > { %s793_s9 = scalar_lea.hbm %s986_s0, %s496_s6  ;;  %s196_s11 = sshll.u32 %s189_s10, 4  ;;  %s795_s11 = int_to_ptr.vmem [resolvable:$true] %s196_s11 }
  0x10   : > { %p797_p8 = pnand %p613_p6, %p35_p4  ;;  %s186_s13 = scalar_lea.sflag [#allocation4], %s185_s29 }
  0x11   : > { %s648_s14 = scalar_lea.hbm %s793_s9, 128  ;;  %s653_s17 = scalar_lea.hbm %s986_s0, 512 }
  0x12   : > { %p649_p11 = scmp.ne.s32.totalorder %s793_s9, %s648_s14  ;;  %p650_p12 = pneg %p797_p8 }
  0x13   : > { %p654_p1 = scmp.lt.s32.totalorder %s793_s9, %s986_s0  ;;  %p655_p2 = scmp.lt.s32.totalorder %s653_s17, %s648_s14 }
  0x14   : > { %p651_p13 = pnand %p650_p12, %p649_p11 }
  0x15   : > { %p656_p3 = por %p655_p2, %p654_p1 }
  0x16   : > { %p652_p0 = pneg %p651_p13 }
  0x18   : > { %p657_p4 = pnand %p656_p3, %p652_p0 }
  0x1a   : > { %660 = shalt.err (!%p657_p4)
}
  0x1b   : > { %s661_s20 = scalar_lea.vmem %s795_s11, 128  ;;  %s712_s25 = smov [#allocation3]  }
  0x1c   : > { %p662_p5 = scmp.ne.s32.totalorder %s795_s11, %s661_s20  ;;  %s666_s26 = sshll.u32 %s712_s25, 4  ;;  %s667_s26 = int_to_ptr.vmem [resolvable:$false] %s666_s26 }
  0x1d   : > { %s668_s29 = scalar_lea.vmem %s667_s26, 256  ;;  %p669_p13 = scmp.lt.s32.totalorder %s795_s11, %s667_s26 }
  0x1e   : > { %p664_p6 = pnand %p662_p5, %p650_p12  ;;  %p670_p9 = scmp.lt.s32.totalorder %s668_s29, %s661_s20 }
  0x20   : > { %p665_p11 = pneg %p664_p6  ;;  %p671_p10 = por %p670_p9, %p669_p13 }
  0x22   : > { %p672_p7 = pnand %p671_p10, %p665_p11 }
  0x24   : > { %675 = shalt.err (!%p672_p7)
}
  0x25   : > { %612 = dma.hbm_to_vmem [thread:$0]  (!%p797_p8), %s793_s9, 128, %s795_s11, %s186_s13  }
  0x26   : > { %p995_p0 = scmp.lt.s32.totalorder %s710_s23, 5  ;;  %p996_p1 = scmp.ge.s32.totalorder %s710_s23, 1 }
  0x28   : > { %p202_p12 = pnand %p996_p1, %p995_p0 }
  0x29   : > { %s207_s30 = sand.u32 (!%p202_p12), 1, %s702_s21   ;;  %p997_p7 = scmp.ne.s32.totalorder (!%p202_p12), %s993_s28, 0 }
  0x2a   : > { %205 = sbr.rel (%p202_p12) target bundleno = 475 (0x1db), region = 40  ;;  %s826_s6 = sshll.u32 (!%p202_p12), %s207_s30, 3 }
  0x2b   : > { %s208_s7 = scalar_lea.sflag (!%p202_p12), [#allocation4], %s207_s30  ;;  %s211_s8 = scalar_lea.vmem (!%p202_p12), [#allocation3], %s826_s6 }
  0x2f   : > { %693 = dma.done.wait (%p997_p7), %s208_s7, 128  }
  0x30   : > { %695 = vsyncadd (%p997_p7), %s208_s7, 4294967168  ;;  %v713_v0 = vmov 0.0   ;;  %vm714_vm0 = vmmov 0   ;;  %v257_v1 = vld [vmem:[%s987_s1 + $0x78] sm:$0xff]  ;;  %v256_v2 = vld [vmem:[%s987_s1 + $0x70] sm:$0xff]  ;;  %p237_p8 = scmp.lt.s32.totalorder %s767_s4, 3 }
  0x31   : > { %537 = vmatprep.subr.mxu0 %v713_v0  ;;  %569 = vmatprep.mubr.msk.f32.mxu0 %vm714_vm0, %v713_v0  ;;  %v255_v3 = vld [vmem:[%s987_s1 + $0x68] sm:$0xff]  ;;  %v254_v4 = vld [vmem:[%s987_s1 + $0x60] sm:$0xff]  ;;  %v351_v5 = vld [vmem:[%s989_s3 + $0x78] sm:$0xff]  ;;  %s422_s14 = sld [smem:[#allocation2]]  ;;  %vm425_vm1 = vcmask 64512  }
  0x32   : > { %572 = vmatprep.subr.mxu1 %v713_v0  ;;  %604 = vmatprep.mubr.msk.f32.mxu1 %vm714_vm0, %v713_v0  ;;  %v253_v6 = vld [vmem:[%s987_s1 + $0x58] sm:$0xff]  ;;  %v350_v7 = vld [vmem:[%s989_s3 + $0x70] sm:$0xff]  ;;  %v349_v8 = vld [vmem:[%s989_s3 + $0x68] sm:$0xff]  ;;  %s1003_s4 = smov (!%p237_p8, %s767_s4), 3 }
  0x33   : > { %538 = vmatpush3.msra.mxu0 %v257_v1  ;;  %573 = vmatpush3.msra.mxu1 %v351_v5  ;;  %v252_v9 = vld [vmem:[%s987_s1 + $0x50] sm:$0xff]  ;;  %v348_v10 = vld [vmem:[%s989_s3 + $0x60] sm:$0xff]  ;;  %v251_v11 = vld [vmem:[%s987_s1 + $0x48] sm:$0xff]  ;;  %s499_s15 = sshll.u32 %s1003_s4, 3 }
  0x34   : > { %539 = vmatprep.subr.mxu0 %v713_v0  ;;  %574 = vmatprep.subr.mxu1 %v713_v0  ;;  %v347_v12 = vld [vmem:[%s989_s3 + $0x58] sm:$0xff]  ;;  %v250_v13 = vld [vmem:[%s987_s1 + $0x40] sm:$0xff]  ;;  %v346_v14 = vld [vmem:[%s989_s3 + $0x50] sm:$0xff]  ;;  %s240_s18 = scalar_lea.vmem %s991_s5, %s499_s15 }
  0x35   : > { %540 = vmatpush3.msra.mxu0 %v256_v2  ;;  %575 = vmatpush3.msra.mxu1 %v350_v7  ;;  %v249_v15 = vld [vmem:[%s987_s1 + $0x38] sm:$0xff]  ;;  %v345_v16 = vld [vmem:[%s989_s3 + $0x48] sm:$0xff]  ;;  %v248_v17 = vld [vmem:[%s987_s1 + $0x30] sm:$0xff] }
  0x36   : > { %541 = vmatprep.subr.mxu0 %v713_v0  ;;  %576 = vmatprep.subr.mxu1 %v713_v0  ;;  %v344_v18 = vld [vmem:[%s989_s3 + $0x40] sm:$0xff]  ;;  %v247_v19 = vld [vmem:[%s987_s1 + $0x28] sm:$0xff]  ;;  %v343_v20 = vld [vmem:[%s989_s3 + $0x38] sm:$0xff] }
  0x37   : > { %542 = vmatpush3.msra.mxu0 %v255_v3  ;;  %577 = vmatpush3.msra.mxu1 %v349_v8  ;;  %v246_v21 = vld [vmem:[%s987_s1 + $0x20] sm:$0xff]  ;;  %v342_v22 = vld [vmem:[%s989_s3 + $0x30] sm:$0xff]  ;;  %v245_v23 = vld [vmem:[%s987_s1 + $0x18] sm:$0xff]  ;;  %v423_v39 = vstv %s422_s14 }
  0x38   : > { %543 = vmatprep.subr.mxu0 %v713_v0  ;;  %578 = vmatprep.subr.mxu1 %v713_v0  ;;  %v341_v24 = vld [vmem:[%s989_s3 + $0x28] sm:$0xff]  ;;  %v244_v25 = vld [vmem:[%s987_s1 + $0x10] sm:$0xff]  ;;  %v340_v26 = vld [vmem:[%s989_s3 + $0x20] sm:$0xff] }
  0x39   : > { %544 = vmatpush3.msra.mxu0 %v254_v4  ;;  %579 = vmatpush3.msra.mxu1 %v348_v10  ;;  %v243_v27 = vld [vmem:[%s987_s1 + $0x8] sm:$0xff]  ;;  %v339_v28 = vld [vmem:[%s989_s3 + $0x18] sm:$0xff]  ;;  %v242_v29 = vld [vmem:[%s987_s1] sm:$0xff] }
  0x3a   : > { %545 = vmatprep.subr.mxu0 %v713_v0  ;;  %580 = vmatprep.subr.mxu1 %v713_v0  ;;  %v241_v30 = vld [vmem:[%s211_s8] sm:$0xff]  ;;  %v338_v31 = vld [vmem:[%s989_s3 + $0x10] sm:$0xff] }
  0x3b   : > { %546 = vmatpush3.msra.mxu0 %v253_v6  ;;  %581 = vmatpush3.msra.mxu1 %v347_v12  ;;  %v337_v32 = vld [vmem:[%s989_s3 + $0x8] sm:$0xff]  ;;  %v336_v33 = vld [vmem:[%s989_s3] sm:$0xff] }
  0x3c   : > { %547 = vmatprep.subr.mxu0 %v713_v0  ;;  %582 = vmatprep.subr.mxu1 %v713_v0  ;;  %v500_v34 = vld [vmem:[%s988_s2] ss:$0 sm:$0xff] }
  0x3d   : > { %548 = vmatpush3.msra.mxu0 %v252_v9  ;;  %583 = vmatpush3.msra.mxu1 %v346_v14 }
  0x3e   : > { %549 = vmatprep.subr.mxu0 %v713_v0  ;;  %584 = vmatprep.subr.mxu1 %v713_v0 }
  0x3f   : > { %550 = vmatpush3.msra.mxu0 %v251_v11  ;;  %585 = vmatpush3.msra.mxu1 %v345_v16 }
  0x40   : > { %551 = vmatprep.subr.mxu0 %v713_v0  ;;  %586 = vmatprep.subr.mxu1 %v713_v0 }
  0x41   : > { %552 = vmatpush3.msra.mxu0 %v250_v13  ;;  %587 = vmatpush3.msra.mxu1 %v344_v18 }
  0x42   : > { %553 = vmatprep.subr.mxu0 %v713_v0  ;;  %588 = vmatprep.subr.mxu1 %v713_v0 }
  0x43   : > { %554 = vmatpush3.msra.mxu0 %v249_v15  ;;  %589 = vmatpush3.msra.mxu1 %v343_v20 }
  0x44   : > { %555 = vmatprep.subr.mxu0 %v713_v0  ;;  %590 = vmatprep.subr.mxu1 %v713_v0 }
  0x45   : > { %556 = vmatpush3.msra.mxu0 %v248_v17  ;;  %591 = vmatpush3.msra.mxu1 %v342_v22 }
  0x46   : > { %557 = vmatprep.subr.mxu0 %v713_v0  ;;  %592 = vmatprep.subr.mxu1 %v713_v0 }
  0x47   : > { %558 = vmatpush3.msra.mxu0 %v247_v19  ;;  %593 = vmatpush3.msra.mxu1 %v341_v24 }
  0x48   : > { %559 = vmatprep.subr.mxu0 %v713_v0  ;;  %594 = vmatprep.subr.mxu1 %v713_v0 }
  0x49   : > { %560 = vmatpush3.msra.mxu0 %v246_v21  ;;  %595 = vmatpush3.msra.mxu1 %v340_v26 }
  0x4a   : > { %561 = vmatprep.subr.mxu0 %v713_v0  ;;  %596 = vmatprep.subr.mxu1 %v713_v0 }
  0x4b   : > { %562 = vmatpush3.msra.mxu0 %v245_v23  ;;  %597 = vmatpush3.msra.mxu1 %v339_v28 }
  0x4c   : > { %563 = vmatprep.subr.mxu0 %v713_v0  ;;  %598 = vmatprep.subr.mxu1 %v713_v0 }
  0x4d   : > { %564 = vmatpush3.msra.mxu0 %v244_v25  ;;  %599 = vmatpush3.msra.mxu1 %v338_v31 }
  0x4e   : > { %565 = vmatprep.subr.mxu0 %v713_v0  ;;  %600 = vmatprep.subr.mxu1 %v713_v0 }
  0x4f   : > { %566 = vmatpush3.msra.mxu0 %v243_v27  ;;  %601 = vmatpush3.msra.mxu1 %v337_v32 }
  0x50   : > { %567 = vmatprep.subr.mxu0 %v713_v0  ;;  %602 = vmatprep.subr.mxu1 %v713_v0 }
  0x51   : > { %568 = vmatpush3.msra.mxu0 %v242_v29  ;;  %603 = vmatpush3.msra.mxu1 %v336_v33 }
  0x52   : > { %570 = vmatmul.mubr.f32.vlgmr.msra.gmra.mxu0 %v241_v30 }
 0x112   : > { %v331_v35 = vpop.f32.mrf.mxu0 }
 0x113   : > { %v332_v36 = vadd.f32 %v500_v34, %v331_v35 }
 0x114   : > { %v571_v37 = vpop.f32.mrf.mxu0 }
 0x115   : > { %v335_v38 = vmul.f32 %v332_v36, %v241_v30 }
 0x117   : > { %605 = vmatmul.mubr.f32.vlgmr.msra.gmra.mxu1 %v335_v38 }
 0x1d7   : > { %v418_v40 = vpop.f32.mrf.mxu1 }
 0x1d8   : > { %v424_v41 = vsub.f32 %v418_v40, %v423_v39 }
 0x1d9   : > { %v606_v42 = vpop.f32.mrf.mxu1 }
 0x1da   : > { %426 = vst.msk [vmem:[%s240_s18] sm:$0xff] %vm425_vm1, %v424_v41 }
 0x1db PF: > { %p16_p9 = scmp.ge.s32.totalorder %s770_s24, 6   ;;  %s998_s20 = smov %s702_s21 }
 0x1dc   : > { %s999_s21 = smov %s706_s22  ;;  %s1000_s22 = smov %s780_s27 }
 0x1dd   : > { %s1001_s23 = smov %s770_s24  ;;  %18 = sbr.rel (!%p16_p9) target bundleno = 5 (0x5), region = 80 }
 0x1e2   :  { %446 = vsyncpa [#allocation4], 1 }
 0x1e3   :  { %448 = vsyncpa [#allocation4 + $0x1], 1 }

</bundles_post_ra>
